<compile_context>
chip_gen: v7x
topology: tpu7x:2x2x1
jax: 0.10.0
libtpu: 0.0.40
codegen_flags: <defaults>
</compile_context>

<pallas_src>
import functools
import math

import jax
import jax.numpy as jnp
from jax.experimental import pallas as pl
from jax.experimental.pallas import tpu as pltpu

_LANE = 128
_VMEM_LIMIT_BYTES = 32 * 1024 * 1024  # safe on v5e/v6e/v7x; >> ~12 MiB used


def _rgb_to_hsv_kernel(eps, img_ref, out_ref):
    # Block shape: (1, 3, R, Cols); works for both the flat and the 4D path.
    r = img_ref[0, 0, :, :].astype(jnp.float32)
    g = img_ref[0, 1, :, :].astype(jnp.float32)
    b = img_ref[0, 2, :, :].astype(jnp.float32)

    maxc = jnp.maximum(r, jnp.maximum(g, b))
    minc = jnp.minimum(r, jnp.minimum(g, b))

    v = maxc
    deltac = maxc - minc
    # s = deltac / (v + eps), via exact reciprocal (stays within 1e-5 of ref)
    s = deltac * pl.reciprocal(v + eps, approx=False)

    # Replace zero deltac with 1 (as in the torch reference) before hue math.
    deltac_safe = jnp.where(deltac == 0.0, 1.0, deltac)
    inv_d = pl.reciprocal(deltac_safe, approx=False)

    rc = maxc - r
    gc = maxc - g
    bc = maxc - b

    # Hue in "sixths": the selected candidate is always in [-1, 5].
    h_r = (bc - gc) * inv_d
    h_g = (rc - bc) * inv_d + 2.0
    h_b = (gc - rc) * inv_d + 4.0

    # First channel attaining the max: r -> 0, g -> 1, b -> 2 (matches torch's
    # cumsum first-occurrence gather).
    h6 = jnp.where(r == maxc, h_r, jnp.where(g == maxc, h_g, h_b))

    # h = 2*pi * mod(h6/6, 1)  ==  h6*(pi/3) wrapped into [0, 2*pi).
    h = h6 * (math.pi / 3.0)
    h = jnp.where(h < 0.0, h + 2.0 * math.pi, h)

    out_ref[0, 0, :, :] = h.astype(out_ref.dtype)
    out_ref[0, 1, :, :] = s.astype(out_ref.dtype)
    out_ref[0, 2, :, :] = v.astype(out_ref.dtype)


def rgb_to_hsv_pallas(image: jax.Array, eps: float = 1e-6,
                      tile_rows: int = 2048) -> jax.Array:
    """image: (B, 3, H, W) float array -> (B, 3, H, W) HSV (h in radians)."""
    if image.ndim != 4 or image.shape[1] != 3:
        raise ValueError(f"Expected (B, 3, H, W), got {image.shape}")
    B, C, H, W = image.shape
    M = H * W

    compiler_params = pltpu.CompilerParams(
        dimension_semantics=("parallel", "parallel"),
        vmem_limit_bytes=_VMEM_LIMIT_BYTES,
    )
    kernel = functools.partial(_rgb_to_hsv_kernel, eps)

    if M % _LANE == 0:
        # Lane-dense fast path: contiguous (free) reshape to (B, 3, rows, 128),
        # unmasked 128-wide stores, large row tiles, no padding anywhere.
        rows = M // _LANE
        if rows <= tile_rows:
            t_r = rows                              # full-dim block
        else:
            t_r = max(8, (tile_rows // 8) * 8)      # legal sublane tile
        grid = (B, pl.cdiv(rows, t_r))              # ragged last tile is masked

        x = image.reshape(B, C, rows, _LANE)
        out = pl.pallas_call(
            kernel,
            out_shape=jax.ShapeDtypeStruct((B, C, rows, _LANE), image.dtype),
            grid_spec=pltpu.PrefetchScalarGridSpec(
                num_scalar_prefetch=0,
                grid=grid,
                in_specs=[pl.BlockSpec((1, C, t_r, _LANE),
                                       lambda bi, ri: (bi, 0, ri, 0))],
                out_specs=pl.BlockSpec((1, C, t_r, _LANE),
                                       lambda bi, ri: (bi, 0, ri, 0)),
            ),
            compiler_params=compiler_params,
        )(x)
        return out.reshape(B, C, H, W)

    # Ragged path (H*W not 128-divisible): block the original layout with the
    # full last dim W (masked lane stores) and tile H.  This avoids the extra
    # pad + slice HBM passes of the previous version.
    target_elems = tile_rows * _LANE                # per-channel block budget
    desired = max(1, target_elems // W)
    if desired >= H:
        t_h = H                                     # full-dim block
    else:
        t_h = max(8, (desired // 8) * 8)            # legal sublane tile
        if t_h >= H:
            t_h = H
    grid = (B, pl.cdiv(H, t_h))                     # ragged last tile is masked

    out = pl.pallas_call(
        kernel,
        out_shape=jax.ShapeDtypeStruct((B, C, H, W), image.dtype),
        grid_spec=pltpu.PrefetchScalarGridSpec(
            num_scalar_prefetch=0,
            grid=grid,
            in_specs=[pl.BlockSpec((1, C, t_h, W),
                                   lambda bi, hi: (bi, 0, hi, 0))],
            out_specs=pl.BlockSpec((1, C, t_h, W),
                                   lambda bi, hi: (bi, 0, hi, 0)),
        ),
        compiler_params=compiler_params,
    )(image)
    return out


def _rgb_to_hsv_ref(image: jax.Array, eps: float = 1e-6) -> jax.Array:
    # Pure-JAX reference mirroring the torch code (true divides, mod-1 wrap).
    r = image[..., 0, :, :]
    g = image[..., 1, :, :]
    b = image[..., 2, :, :]
    maxc = jnp.maximum(r, jnp.maximum(g, b))
    minc = jnp.minimum(r, jnp.minimum(g, b))
    v = maxc
    deltac = maxc - minc
    s = deltac / (v + eps)
    deltac_safe = jnp.where(deltac == 0, jnp.ones_like(deltac), deltac)
    rc, gc, bc = maxc - r, maxc - g, maxc - b
    h = jnp.where(r == maxc, bc - gc,
                  jnp.where(g == maxc, 2.0 * deltac_safe + rc - bc,
                            4.0 * deltac_safe + gc - rc))
    h = h / deltac_safe
    h = jnp.mod(h / 6.0, 1.0)
    h = 2.0 * math.pi * h
    return jnp.stack([h, s, v], axis=-3)


def _check(x, **kwargs):
    out = jax.block_until_ready(rgb_to_hsv_pallas(x, eps=1e-6, **kwargs))
    ref = _rgb_to_hsv_ref(x, eps=1e-6)
    assert out.shape == x.shape, (out.shape, x.shape)
    assert jnp.allclose(out, ref, atol=1e-5, rtol=1e-5)


if __name__ == "__main__":
    key = jax.random.PRNGKey(0)
    k1, k2, k3, k4 = jax.random.split(key, 4)

    # 1) Fast path, single block (H*W divisible by 128).
    _check(jax.random.uniform(k1, (2, 3, 16, 16), dtype=jnp.float32))

    # 2) Ragged path, full-array block (H*W not divisible by 128).
    _check(jax.random.uniform(k2, (1, 3, 17, 23), dtype=jnp.float32))

    # 3) Fast path with row tiling + ragged (masked) last row tile.
    _check(jax.random.uniform(k3, (1, 3, 40, 128), dtype=jnp.float32),
           tile_rows=16)

    # 4) Ragged path with H tiling + masked lane/row stores.
    _check(jax.random.uniform(k4, (1, 3, 37, 200), dtype=jnp.float32),
           tile_rows=8)

    print("KERNEL_OK")
</pallas_src>

<mosaic_0001>
module attributes {stable_mosaic.version = 11 : i64} {
  func.func @_rgb_to_hsv_kernel(%arg0: i32, %arg1: i32, %arg2: memref<1x3x2x128xf32, #tpu.memory_space<vmem>>, %arg3: memref<1x3x2x128xf32, #tpu.memory_space<vmem>>) attributes {dimension_semantics = [#tpu.dimension_semantics<parallel>, #tpu.dimension_semantics<parallel>], iteration_bounds = array<i64: 2, 1>, scalar_prefetch = 0 : i64, scratch_operands = 0 : i64, tpu.core_type = #tpu.core_type<tc>, window_params = [{transform_indices = @transform_0, window_bounds = array<i64: 1, 3, 2, 128>}, {transform_indices = @transform_1, window_bounds = array<i64: 1, 3, 2, 128>}]} {
    %c0 = arith.constant 0 : index
    %c0_0 = arith.constant 0 : index
    %c0_1 = arith.constant 0 : index
    %c0_2 = arith.constant 0 : index
    %0 = vector.load %arg2[%c0, %c0_0, %c0_1, %c0_2] : memref<1x3x2x128xf32, #tpu.memory_space<vmem>>, vector<1x1x2x128xf32>
    %1 = vector.shape_cast %0 : vector<1x1x2x128xf32> to vector<2x128xf32>
    %c0_3 = arith.constant 0 : index
    %c1 = arith.constant 1 : index
    %c0_4 = arith.constant 0 : index
    %c0_5 = arith.constant 0 : index
    %2 = vector.load %arg2[%c0_3, %c1, %c0_4, %c0_5] : memref<1x3x2x128xf32, #tpu.memory_space<vmem>>, vector<1x1x2x128xf32>
    %3 = vector.shape_cast %2 : vector<1x1x2x128xf32> to vector<2x128xf32>
    %c0_6 = arith.constant 0 : index
    %c2 = arith.constant 2 : index
    %c0_7 = arith.constant 0 : index
    %c0_8 = arith.constant 0 : index
    %4 = vector.load %arg2[%c0_6, %c2, %c0_7, %c0_8] : memref<1x3x2x128xf32, #tpu.memory_space<vmem>>, vector<1x1x2x128xf32>
    %5 = vector.shape_cast %4 : vector<1x1x2x128xf32> to vector<2x128xf32>
    %6 = arith.maximumf %3, %5 : vector<2x128xf32>
    %7 = arith.maximumf %1, %6 : vector<2x128xf32>
    %8 = arith.minimumf %3, %5 : vector<2x128xf32>
    %9 = arith.minimumf %1, %8 : vector<2x128xf32>
    %10 = arith.subf %7, %9 : vector<2x128xf32>
    %cst = arith.constant 9.99999997E-7 : f32
    %11 = vector.broadcast %cst : f32 to vector<2x128xf32>
    %12 = arith.addf %7, %11 : vector<2x128xf32>
    %13 = tpu.reciprocal %12 : vector<2x128xf32> -> vector<2x128xf32>
    %14 = arith.mulf %10, %13 : vector<2x128xf32>
    %cst_9 = arith.constant 0.000000e+00 : f32
    %15 = vector.broadcast %cst_9 : f32 to vector<2x128xf32>
    %16 = arith.cmpf oeq, %10, %15 : vector<2x128xf32>
    %cst_10 = arith.constant 1.000000e+00 : f32
    %17 = vector.broadcast %cst_10 : f32 to vector<2x128xf32>
    %18 = arith.select %16, %17, %10 : vector<2x128xi1>, vector<2x128xf32>
    %19 = tpu.reciprocal %18 : vector<2x128xf32> -> vector<2x128xf32>
    %20 = arith.subf %7, %1 : vector<2x128xf32>
    %21 = arith.subf %7, %3 : vector<2x128xf32>
    %22 = arith.subf %7, %5 : vector<2x128xf32>
    %23 = arith.subf %22, %21 : vector<2x128xf32>
    %24 = arith.mulf %23, %19 : vector<2x128xf32>
    %25 = arith.subf %20, %22 : vector<2x128xf32>
    %26 = arith.mulf %25, %19 : vector<2x128xf32>
    %cst_11 = arith.constant 2.000000e+00 : f32
    %27 = vector.broadcast %cst_11 : f32 to vector<2x128xf32>
    %28 = arith.addf %26, %27 : vector<2x128xf32>
    %29 = arith.subf %21, %20 : vector<2x128xf32>
    %30 = arith.mulf %29, %19 : vector<2x128xf32>
    %cst_12 = arith.constant 4.000000e+00 : f32
    %31 = vector.broadcast %cst_12 : f32 to vector<2x128xf32>
    %32 = arith.addf %30, %31 : vector<2x128xf32>
    %33 = arith.cmpf oeq, %1, %7 : vector<2x128xf32>
    %34 = arith.cmpf oeq, %3, %7 : vector<2x128xf32>
    %35 = arith.select %34, %28, %32 : vector<2x128xi1>, vector<2x128xf32>
    %36 = arith.select %33, %24, %35 : vector<2x128xi1>, vector<2x128xf32>
    %cst_13 = arith.constant 1.04719758 : f32
    %37 = vector.broadcast %cst_13 : f32 to vector<2x128xf32>
    %38 = arith.mulf %36, %37 : vector<2x128xf32>
    %cst_14 = arith.constant 0.000000e+00 : f32
    %39 = vector.broadcast %cst_14 : f32 to vector<2x128xf32>
    %40 = arith.cmpf olt, %38, %39 : vector<2x128xf32>
    %cst_15 = arith.constant 6.28318548 : f32
    %41 = vector.broadcast %cst_15 : f32 to vector<2x128xf32>
    %42 = arith.addf %38, %41 : vector<2x128xf32>
    %43 = arith.select %40, %42, %38 : vector<2x128xi1>, vector<2x128xf32>
    %c0_16 = arith.constant 0 : index
    %c0_17 = arith.constant 0 : index
    %c0_18 = arith.constant 0 : index
    %c0_19 = arith.constant 0 : index
    %44 = vector.load %arg3[%c0_16, %c0_17, %c0_18, %c0_19] : memref<1x3x2x128xf32, #tpu.memory_space<vmem>>, vector<1x1x2x128xf32>
    %45 = vector.shape_cast %44 : vector<1x1x2x128xf32> to vector<2x128xf32>
    %46 = vector.shape_cast %43 : vector<2x128xf32> to vector<1x1x2x128xf32>
    tpu.vector_store %arg3[%c0_16, %c0_17, %c0_18, %c0_19], %46 {strides = array<i32>} : memref<1x3x2x128xf32, #tpu.memory_space<vmem>>, vector<1x1x2x128xf32>,
    %c0_20 = arith.constant 0 : index
    %c1_21 = arith.constant 1 : index
    %c0_22 = arith.constant 0 : index
    %c0_23 = arith.constant 0 : index
    %47 = vector.load %arg3[%c0_20, %c1_21, %c0_22, %c0_23] : memref<1x3x2x128xf32, #tpu.memory_space<vmem>>, vector<1x1x2x128xf32>
    %48 = vector.shape_cast %47 : vector<1x1x2x128xf32> to vector<2x128xf32>
    %49 = vector.shape_cast %14 : vector<2x128xf32> to vector<1x1x2x128xf32>
    tpu.vector_store %arg3[%c0_20, %c1_21, %c0_22, %c0_23], %49 {strides = array<i32>} : memref<1x3x2x128xf32, #tpu.memory_space<vmem>>, vector<1x1x2x128xf32>,
    %c0_24 = arith.constant 0 : index
    %c2_25 = arith.constant 2 : index
    %c0_26 = arith.constant 0 : index
    %c0_27 = arith.constant 0 : index
    %50 = vector.load %arg3[%c0_24, %c2_25, %c0_26, %c0_27] : memref<1x3x2x128xf32, #tpu.memory_space<vmem>>, vector<1x1x2x128xf32>
    %51 = vector.shape_cast %50 : vector<1x1x2x128xf32> to vector<2x128xf32>
    %52 = vector.shape_cast %7 : vector<2x128xf32> to vector<1x1x2x128xf32>
    tpu.vector_store %arg3[%c0_24, %c2_25, %c0_26, %c0_27], %52 {strides = array<i32>} : memref<1x3x2x128xf32, #tpu.memory_space<vmem>>, vector<1x1x2x128xf32>,
    return
  }
  func.func @transform_0(%arg0: i32, %arg1: i32) -> (i32, i32, i32, i32) {
    %c0_i32 = arith.constant 0 : i32
    %c0_i32_0 = arith.constant 0 : i32
    %c0_i32_1 = arith.constant 0 : i32
    return %arg0, %c0_i32, %arg1, %c0_i32_0 : i32, i32, i32, i32
  }
  func.func @transform_1(%arg0: i32, %arg1: i32) -> (i32, i32, i32, i32) {
    %c0_i32 = arith.constant 0 : i32
    %c0_i32_0 = arith.constant 0 : i32
    %c0_i32_1 = arith.constant 0 : i32
    return %arg0, %c0_i32, %arg1, %c0_i32_0 : i32, i32, i32, i32
  }
}

</mosaic_0001>

<bundles_post_ra>
// kernel: tpu_custom_call.1
= control target key start
LH: loop header
LB: loop body
LE: loop exit
PB: predicated region body
PF: predicated region fallthrough
CT: control target
= control target key end

     0   :  { %6 = vsyncpa [#allocation3], 0  ;;  %s690_s0 = inlined_call_operand.hbm [shape: f32[2,3,2,128], index: 0, kind: input, shape index: {}]   ;;  %s691_s1 = inlined_call_operand.hbm [shape: f32[2,3,2,128], index: 1, kind: output, shape index: {}]  }
   0x1   :  { %8 = vsyncpa [#allocation3 + $0x1], 0 }
   0x2   :  { %9 = vsyncpa [#allocation4], 0 }
   0x3   :  { %11 = vsyncpa [#allocation4 + $0x1], 0  ;;  %s509_s6 = smov 0   ;;  %s511_s7 = smov 0  }
   0x4   :  { %s513_s8 = smov 0   ;;  %s515_s9 = smov 0  }
   0x5   :  { %s517_s10 = smov 0   ;;  %s519_s11 = smov 0  }
   0x6 LB: > { %s292_s12 = sadd.s32 4294967295, %s491_s11   ;;  %s293_s13 = sadd.s32 4294967294, %s491_s11   ;;  %s491_s11 = sphi %s519_s11, %s17_s11   ;;  %s487_s10 = sphi %s517_s10, %s706_s10   ;;  %s483_s9 = sphi %s515_s9, %s705_s9   ;;  %s479_s8 = sphi %s513_s8, %s704_s8   ;;  %s475_s7 = sphi %s511_s7, %s703_s7   ;;  %s471_s6 = sphi %s509_s6, %s702_s6  }
   0x7   : > { %s29_s14 = sadd.s32 1, %s487_s10  ;;  %s38_s15 = sadd.s32 1, %s479_s8 }
   0x8   : > { %p31_p0 = scmp.ge.s32.totalorder %s29_s14, 2  ;;  %p45_p1 = scmp.ne.s32.totalorder %s479_s8, %s475_s7 }
   0x9   : > { %p46_p2 = scmp.eq.s32.totalorder %s491_s11, 0  ;;  %p51_p3 = scmp.ne.s32.totalorder %s475_s7, %s471_s6 }
   0xa   : > { %s708_s14 = smov (%p31_p0, %s29_s14), 0  ;;  %p52_p5 = scmp.eq.s32.totalorder %s292_s12, 0 }
   0xb   : > { %p550_p4 = por %p46_p2, %p45_p1  ;;  %s33_s17 = ssub.s32 %s487_s10, %s708_s14 }
   0xc   : > { %p77_p6 = scmp.eq.s32.totalorder %s292_s12, 1  ;;  %p36_p7 = scmp.eq.s32.totalorder %s33_s17, 0 }
   0xd   : > { %p556_p8 = por %p52_p5, %p51_p3  ;;  %p83_p10 = scmp.eq.s32.totalorder %s293_s13, 1 }
   0xe   : > { %p560_p9 = por %p77_p6, %p45_p1  ;;  %p321_p13 = scmp.lt.s32.totalorder %s491_s11, 2 }
   0xf   : > { %s565_s20 = scalar_select %p36_p7, %s479_s8, %s38_s15  }
  0x10   : > { %s695_s19 = scalar_select %p560_p9, 1, 0 }
  0x11   : > { %p567_p11 = por %p83_p10, %p51_p3  ;;  %s103_s22 = sand.u32 1, %s479_s8  }
  0x12   : > { %s305_s23 = smul.u32 6, %s103_s22  ;;  %p577_p0 = pnand %p321_p13, %p550_p4 }
  0x13   : > { %s696_s21 = scalar_select %p567_p11, 1, 0 }
  0x14   : > { %s306_s24 = smul.u32 96, %s487_s10  ;;  %s107_s29 = scalar_lea.vmem [#allocation2], %s305_s23 }
  0x15   : > { %s115_s30 = sshll.u32 %s107_s29, 4  ;;  %s589_s2 = scalar_lea.sflag [#allocation3], %s103_s22  ;;  %s586_s30 = int_to_ptr.vmem [resolvable:$true] %s115_s30 }
  0x16   : > { %s584_s28 = scalar_lea.hbm %s690_s0, %s306_s24  ;;  %p381_p3 = pneg %p577_p0 }
  0x17   : > { %s379_s3 = scalar_lea.hbm %s584_s28, 96  ;;  %s384_s12 = scalar_lea.hbm %s690_s0, 192 }
  0x18   : > { %p380_p2 = scmp.ne.s32.totalorder %s584_s28, %s379_s3  ;;  %p385_p6 = scmp.lt.u32.totalorder %s584_s28, %s690_s0 }
  0x19   : > { %p386_p7 = scmp.lt.u32.totalorder %s384_s12, %s379_s3  ;;  %p388_p13 = scmp.lt.u32.totalorder %s379_s3, %s584_s28 }
  0x1a   : > { %p382_p4 = pnand %p381_p3, %p380_p2 }
  0x1b   : > { %p387_p10 = por %p386_p7, %p385_p6 }
  0x1c   : > { %p383_p5 = pneg %p382_p4 }
  0x1d   : > { %p389_p12 = por %p388_p13, %p387_p10 }
  0x1f   : > { %p390_p1 = pnand %p389_p12, %p383_p5 }
  0x21   : > { %393 = shalt.err (!%p390_p1)
}
  0x22   : > { %s394_s16 = scalar_lea.vmem %s586_s30, 96  ;;  %s493_s17 = smov [#allocation2]  }
  0x23   : > { %p395_p2 = scmp.ne.s32.totalorder %s586_s30, %s394_s16  ;;  %s399_s22 = sshll.u32 %s493_s17, 4  ;;  %s400_s22 = int_to_ptr.vmem [resolvable:$false] %s399_s22 }
  0x24   : > { %s401_s23 = scalar_lea.vmem %s400_s22, 192  ;;  %p402_p9 = scmp.lt.s32.totalorder %s586_s30, %s400_s22 }
  0x25   : > { %p397_p4 = pnand %p395_p2, %p381_p3  ;;  %p403_p6 = scmp.lt.s32.totalorder %s401_s23, %s394_s16 }
  0x27   : > { %p398_p11 = pneg %p397_p4  ;;  %p404_p7 = por %p403_p6, %p402_p9 }
  0x29   : > { %p405_p10 = pnand %p404_p7, %p398_p11 }
  0x2b   : > { %408 = shalt.err (!%p405_p10)
}
  0x2c   : > { %s494_s24 = smov 32   ;;  %s495_s26 = smov 2  }
  0x2d   : > { %316 = dma.hbm_to_vmem [thread:$0]  (!%p577_p0), %s584_s28, 96, %s586_s30, %s589_s2, %s494_s24, %s494_s24, %s495_s26  }
  0x2e   : > { %p123_p12 = scmp.lt.s32.totalorder %s491_s11, 3  ;;  %p698_p1 = scmp.ge.s32.totalorder %s491_s11, 1 }
  0x30   : > { %p124_p3 = pnand %p698_p1, %p123_p12 }
  0x31   : > { %s621_s27 = sand.u32 (!%p124_p3), 1, %s475_s7  }
  0x32   : > { %127 = sbr.rel (%p124_p3) target bundleno = 105 (0x69), region = 24  ;;  %s130_s3 = scalar_lea.sflag (!%p124_p3), [#allocation3], %s621_s27 }
  0x33   : > { %s307_s29 = smul.u32 (!%p124_p3), 6, %s621_s27 }
  0x35   : > { %s133_s4 = scalar_lea.vmem (!%p124_p3), [#allocation2], %s307_s29 }
  0x39   : > { %462 = dma.done.wait (%p556_p8), %s130_s3, 96  }
  0x3a   : > { %464 = vsyncadd (%p556_p8), %s130_s3, 4294967200  ;;  %v152_v0 = vld [vmem:[%s133_s4] sm:$0x3]  ;;  %v298_v1 = vld [vmem:[%s133_s4 + $0x2] sm:$0x3]  ;;  %s629_s25 = scalar_lea.vmem [#allocation5], %s307_s29 }
  0x3b   : > { %v299_v2 = vld [vmem:[%s133_s4 + $0x4] sm:$0x3]  ;;  %s207_s18 = sshll.u32 %s629_s25, 4  ;;  %s308_s28 = smul.u32 96, %s483_s9  ;;  %s635_s18 = int_to_ptr.vmem [resolvable:$true] %s207_s18 }
  0x3c   : > { %v157_v3 = vmax.f32 %v298_v1, %v299_v2  ;;  %v159_v4 = vmin.f32 %v298_v1, %v299_v2  ;;  %s193_s12 = scalar_lea.sflag [#allocation4], %s621_s27  ;;  %s409_s13 = scalar_lea.vmem %s635_s18, 96 }
  0x3d   : > { %s640_s5 = scalar_lea.hbm %s691_s1, %s308_s28  ;;  %p410_p8 = scmp.ne.s32.totalorder %s635_s18, %s409_s13 }
  0x3e   : > { %v158_v5 = vmax.f32 %v152_v0, %v157_v3  ;;  %v160_v6 = vmin.f32 %v152_v0, %v159_v4  ;;  %p699_p9 = scmp.ne.s32.totalorder %s695_s19, 0  ;;  %s496_s9 = smov [#allocation5]  }
  0x3f   : > { %s413_s15 = sshll.u32 %s496_s9, 4  ;;  %s414_s15 = int_to_ptr.vmem [resolvable:$false] %s413_s15 }
  0x40   : > { %v161_v7 = vsub.f32 %v158_v5, %v160_v6  ;;  %301 = vst [vmem:[%s629_s25 + $0x4] sm:$0x3] %v158_v5  ;;  %v162_v8 = vadd.f32 1e-06, %v158_v5  ;;  %v168_v10 = vsub.f32 %v158_v5, %v152_v0  ;;  %v169_v11 = vsub.f32 %v158_v5, %v298_v1  ;;  %p411_p11 = pnand %p410_p8, %p699_p9  ;;  %s415_s16 = scalar_lea.vmem %s414_s15, 192 }
  0x41   : > { %v170_v12 = vsub.f32 %v158_v5, %v299_v2  ;;  %vm180_vm1 = vcmp.eq.f32.partialorder %v298_v1, %v158_v5  ;;  %vm179_vm2 = vcmp.eq.f32.partialorder %v152_v0, %v158_v5  ;;  %p416_p5 = scmp.lt.s32.totalorder %s635_s18, %s414_s15  ;;  %p417_p13 = scmp.lt.s32.totalorder %s415_s16, %s409_s13 }
  0x42   : > { %vm165_vm0 = vcmp.eq.f32.partialorder %v161_v7, 0.0  ;;  %375 = vrcp.f32 %v162_v8  ;;  %v176_v14 = vsub.f32 %v169_v11, %v168_v10  ;;  %p412_p0 = pneg %p411_p11 }
  0x43   : > { %v166_v9 = vsel %vm165_vm0, 1.0, %v161_v7  ;;  %v173_v13 = vsub.f32 %v168_v10, %v170_v12  ;;  %v171_v15 = vsub.f32 %v170_v12, %v169_v11  ;;  %p418_p2 = por %p417_p13, %p416_p5 }
  0x44   : > { %377 = vrcp.f32 %v166_v9 }
  0x45   : > { %p419_p4 = pnand %p418_p2, %p412_p0 }
  0x4c   : > { %v376_v16 = vpop.eup %375 }
  0x4d   : > { %v164_v18 = vmul.f32 %v376_v16, %v161_v7 }
  0x4e   : > { %v378_v17 = vpop.eup %377 }
  0x4f   : > { %v174_v19 = vmul.f32 %v378_v17, %v173_v13  ;;  %v177_v20 = vmul.f32 %v378_v17, %v176_v14  ;;  %v172_v21 = vmul.f32 %v378_v17, %v171_v15  ;;  %300 = vst [vmem:[%s629_s25 + $0x2] sm:$0x3] %v164_v18 }
  0x51   : > { %v175_v22 = vadd.f32 2.0, %v174_v19  ;;  %v178_v23 = vadd.f32 4.0, %v177_v20 }
  0x53   : > { %v181_v24 = vsel %vm180_vm1, %v175_v22, %v178_v23 }
  0x54   : > { %v182_v25 = vsel %vm179_vm2, %v172_v21, %v181_v24 }
  0x55   : > { %v183_v26 = vmul.f32 1.0471976, %v182_v25 }
  0x57   : > { %vm184_vm3 = vcmp.lt.f32.partialorder %v183_v26, 0.0  ;;  %v185_v27 = vadd.f32 6.2831855, %v183_v26 }
  0x59   : > { %v186_v28 = vsel %vm184_vm3, %v185_v27, %v183_v26 }
  0x5a   : > { %187 = vst [vmem:[%s629_s25] sm:$0x3] %v186_v28 }
  0x5b   : > { %422 = shalt.err (!%p419_p4)
}
  0x5c   : > { %s423_s17 = scalar_lea.hbm %s640_s5, 96  ;;  %s427_s24 = scalar_lea.hbm %s691_s1, 192 }
  0x5d   : > { %p424_p6 = scmp.ne.s32.totalorder %s640_s5, %s423_s17  ;;  %p428_p12 = scmp.lt.u32.totalorder %s640_s5, %s691_s1 }
  0x5e   : > { %p429_p1 = scmp.lt.u32.totalorder %s427_s24, %s423_s17  ;;  %p431_p8 = scmp.lt.u32.totalorder %s423_s17, %s640_s5 }
  0x5f   : > { %p425_p7 = pnand %p424_p6, %p699_p9 }
  0x60   : > { %p430_p3 = por %p429_p1, %p428_p12 }
  0x61   : > { %p426_p10 = pneg %p425_p7 }
  0x62   : > { %p432_p11 = por %p431_p8, %p430_p3 }
  0x64   : > { %p433_p0 = pnand %p432_p11, %p426_p10 }
  0x66   : > { %436 = shalt.err (!%p433_p0)
}
  0x67   : > { %s497_s3 = smov 32   ;;  %s498_s4 = smov 2  }
  0x68   : > { %311 = dma.vmem_to_hbm [thread:$0]  (%p699_p9), %s635_s18, 96, %s640_s5, %s193_s12, %s497_s3, %s497_s3, %s498_s4  }
  0x69 PF: > { %s222_s25 = sand.u32 1, %s471_s6   ;;  %p700_p5 = scmp.ne.s32.totalorder %s696_s21, 0 }
  0x6a   : > { %p701_p13 = scmp.ge.s32.totalorder %s491_s11, 2  ;;  %s223_s28 = scalar_lea.sflag [#allocation4], %s222_s25 }
  0x6c   : > { %p318_p2 = pnand %p701_p13, %p700_p5 }
  0x6e   : > { %466 = dma.done.wait (!%p318_p2), %s223_s28, 96  }
  0x6f   : > { %468 = vsyncadd (!%p318_p2), %s223_s28, 4294967200  ;;  %s17_s11 = sadd.s32 1, %s491_s11   ;;  %s702_s6 = smov %s475_s7 }
  0x70   : > { %p14_p4 = scmp.ge.s32.totalorder %s17_s11, 4   ;;  %s703_s7 = smov %s479_s8 }
  0x71   : > { %s704_s8 = smov %s565_s20  ;;  %s705_s9 = smov %s487_s10 }
  0x72   : > { %s706_s10 = smov %s708_s14  ;;  %16 = sbr.rel (!%p14_p4) target bundleno = 6 (0x6), region = 73 }
  0x79   :  { %228 = vsyncpa [#allocation3], 1 }
  0x7a   :  { %230 = vsyncpa [#allocation3 + $0x1], 1 }
  0x7b   :  { %231 = vsyncpa [#allocation4], 1 }
  0x7c   :  { %233 = vsyncpa [#allocation4 + $0x1], 1 }

</bundles_post_ra>
